<compile_context>
chip_gen: v5e
topology: v5e:2x2
jax: 0.10.0
libtpu: 0.0.40
codegen_flags: <defaults>
</compile_context>

<pallas_src>
import functools
import math

import jax
import jax.numpy as jnp
from jax import lax
from jax.experimental import pallas as pl
from jax.experimental.pallas import tpu as pltpu


_LANE = 128
_BLOCK_BYTES = 2 * 1024 * 1024          # target size of one f32 (tile_m, tile_c) block
_VMEM_LIMIT = 48 * 1024 * 1024          # safe on v5e/v6e (128 MiB) and v7x (64 MiB phys)


def _round_up(x, m):
    return (x + m - 1) // m * m


# ---------------------------------------------------------------------------
# Single pass: full reduction axis resident per C tile (used when it fits).
# ---------------------------------------------------------------------------
def _wn_single_pass_kernel(v_ref, g_ref, w_ref, norm_ref):
    v = v_ref[...]
    if v.dtype != jnp.float32:          # no-op for the f32 module inputs
        v = v.astype(jnp.float32)
    sumsq = jnp.sum(v * v, axis=0, keepdims=True)        # (1, tile_c)
    norm_ref[...] = jnp.sqrt(sumsq)
    scale = g_ref[...] * lax.rsqrt(sumsq)                 # EUP, (1, tile_c)
    w_ref[...] = (v * scale).astype(w_ref.dtype)          # broadcast over sublanes


# ---------------------------------------------------------------------------
# Two-pass scheme for large M.
# Pass 1: accumulate sum-of-squares over M tiles, sqrt on the last tile.
# ---------------------------------------------------------------------------
def _wn_sumsq_kernel(v_ref, norm_ref, *, tile_m, m_total):
    m_idx = pl.program_id(1)

    @pl.when(m_idx == 0)
    def _():
        norm_ref[...] = jnp.zeros_like(norm_ref)

    v = v_ref[...]
    if v.dtype != jnp.float32:
        v = v.astype(jnp.float32)
    if m_total % tile_m != 0:
        # Ragged final M tile: zero out rows past the real extent (static check,
        # mask code only emitted when actually needed).
        rows = lax.broadcasted_iota(jnp.int32, v.shape, 0) + m_idx * tile_m
        v = jnp.where(rows < m_total, v, 0.0)
    norm_ref[...] += jnp.sum(v * v, axis=0, keepdims=True)

    @pl.when(m_idx == pl.num_programs(1) - 1)
    def _():
        norm_ref[...] = jnp.sqrt(norm_ref[...])


# Pass 2: w = v * (g / norm), fully parallel over (C tiles, M tiles).
def _wn_scale_kernel(g_ref, norm_ref, v_ref, w_ref):
    scale = g_ref[...] / norm_ref[...]                    # (1, tile_c), exact
    v = v_ref[...]
    if v.dtype != jnp.float32:
        v = v.astype(jnp.float32)
    w_ref[...] = (v * scale).astype(w_ref.dtype)


# ---------------------------------------------------------------------------
# Wrapper
# ---------------------------------------------------------------------------
def weight_norm_interface(v, g, dim=2, *, block_bytes=_BLOCK_BYTES):
    """Pallas implementation of torch.ops.aten._weight_norm_interface."""
    nd = v.ndim
    dim = dim % nd
    orig_dtype = v.dtype

    if dim != nd - 1:
        # TODO(synk): add a lane-axis-reduction kernel variant so dim != last
        # does not emit two full HBM transposes around the kernel.
        v = jnp.moveaxis(v, dim, -1)
    moved_shape = v.shape
    C = moved_shape[-1]
    M = math.prod(moved_shape[:-1]) if nd > 1 else 1
    v2 = v.reshape(M, C)
    g2 = g.astype(jnp.float32).reshape(1, C)

    # Pad the channel axis to a multiple of 128 so stores stay lane-dense and
    # the C axis stays tileable; padded columns are sliced off afterwards.
    C_pad = _round_up(C, _LANE)
    if C_pad != C:
        v2 = jnp.pad(v2, ((0, 0), (0, C_pad - C)))
        g2 = jnp.pad(g2, ((0, 0), (0, C_pad - C)))

    # tile_c: multiple of 128, <= 1024, divides C_pad, grid_c >= 2 when possible
    # (so the "parallel" channel axis actually splits across v7x's two cores).
    n = C_pad // _LANE
    t = 1
    for cand in range(1, min(8, n // 2) + 1):
        if n % cand == 0:
            t = cand
    tile_c = t * _LANE
    grid_c = C_pad // tile_c

    # Largest M-tile keeping one f32 block near `block_bytes` (multiple of 8).
    max_tile_m = max(8, (block_bytes // (4 * tile_c)) // 8 * 8)

    bytes_v = int(v2.size) * v2.dtype.itemsize
    bytes_norm = C_pad * 4

    if M <= max_tile_m:
        # ------------------ single pass: 1 read + 1 write of v ------------------
        w2, norm2 = pl.pallas_call(
            _wn_single_pass_kernel,
            out_shape=(
                jax.ShapeDtypeStruct((M, C_pad), orig_dtype),
                jax.ShapeDtypeStruct((1, C_pad), jnp.float32),
            ),
            grid_spec=pltpu.PrefetchScalarGridSpec(
                num_scalar_prefetch=0,
                grid=(grid_c,),
                in_specs=[
                    pl.BlockSpec((M, tile_c), lambda j: (0, j)),
                    pl.BlockSpec((1, tile_c), lambda j: (0, j)),
                ],
                out_specs=[
                    pl.BlockSpec((M, tile_c), lambda j: (0, j)),
                    pl.BlockSpec((1, tile_c), lambda j: (0, j)),
                ],
            ),
            compiler_params=pltpu.CompilerParams(
                dimension_semantics=("parallel",),
                vmem_limit_bytes=_VMEM_LIMIT,
            ),
            cost_estimate=pl.CostEstimate(
                flops=3 * M * C_pad,
                transcendentals=2 * C_pad,
                bytes_accessed=2 * bytes_v + 2 * bytes_norm,
            ),
        )(v2, g2)
    else:
        # ------------------ two passes: scales to arbitrary M -------------------
        tile_m = max_tile_m
        grid_m = pl.cdiv(M, tile_m)

        # Pass 1: per-channel L2 norm (reduction axis last, "arbitrary").
        norm2 = pl.pallas_call(
            functools.partial(_wn_sumsq_kernel, tile_m=tile_m, m_total=M),
            out_shape=jax.ShapeDtypeStruct((1, C_pad), jnp.float32),
            grid_spec=pltpu.PrefetchScalarGridSpec(
                num_scalar_prefetch=0,
                grid=(grid_c, grid_m),
                in_specs=[pl.BlockSpec((tile_m, tile_c), lambda j, k: (k, j))],
                out_specs=pl.BlockSpec((1, tile_c), lambda j, k: (0, j)),
            ),
            compiler_params=pltpu.CompilerParams(
                dimension_semantics=("parallel", "arbitrary"),
                vmem_limit_bytes=_VMEM_LIMIT,
            ),
            cost_estimate=pl.CostEstimate(
                flops=2 * M * C_pad,
                transcendentals=C_pad,
                bytes_accessed=bytes_v + bytes_norm,
            ),
        )(v2)

        # Pass 2: w = v * (g / norm), elementwise streaming, fully parallel.
        w2 = pl.pallas_call(
            _wn_scale_kernel,
            out_shape=jax.ShapeDtypeStruct((M, C_pad), orig_dtype),
            grid_spec=pltpu.PrefetchScalarGridSpec(
                num_scalar_prefetch=0,
                grid=(grid_c, grid_m),
                in_specs=[
                    pl.BlockSpec((1, tile_c), lambda j, k: (0, j)),
                    pl.BlockSpec((1, tile_c), lambda j, k: (0, j)),
                    pl.BlockSpec((tile_m, tile_c), lambda j, k: (k, j)),
                ],
                out_specs=pl.BlockSpec((tile_m, tile_c), lambda j, k: (k, j)),
            ),
            compiler_params=pltpu.CompilerParams(
                dimension_semantics=("parallel", "parallel"),
                vmem_limit_bytes=_VMEM_LIMIT,
            ),
            cost_estimate=pl.CostEstimate(
                flops=2 * M * C_pad,
                transcendentals=0,
                bytes_accessed=2 * bytes_v + 2 * bytes_norm,
            ),
        )(g2, norm2, v2)

    # Un-pad and restore the original layout.
    if C_pad != C:
        w2 = w2[:, :C]
        norm2 = norm2[:, :C]
    w = w2.reshape(moved_shape)
    if dim != nd - 1:
        w = jnp.moveaxis(w, -1, dim)
    norm_shape = [1] * nd
    norm_shape[dim] = C
    norm = norm2.reshape(norm_shape)
    return w, norm


if __name__ == "__main__":
    # Shapes matching the torch-mlir e2e test: v (3, 10, 10), g (1, 1, 10), dim=2.
    key = jax.random.PRNGKey(0)
    kv, kg = jax.random.split(key)
    v = jax.random.normal(kv, (3, 10, 10), dtype=jnp.float32)
    g = jax.random.normal(kg, (1, 1, 10), dtype=jnp.float32)

    # Reference: plain-JAX weight_norm_interface semantics (dim=2).
    ref_norm = jnp.sqrt(jnp.sum(v * v, axis=(0, 1), keepdims=True))
    ref_w = v * (g / ref_norm)

    # Default path (single pass, full M resident).
    w, norm = weight_norm_interface(v, g, dim=2)
    w = jax.block_until_ready(w)
    norm = jax.block_until_ready(norm)
    assert w.shape == (3, 10, 10)
    assert norm.shape == (1, 1, 10)
    assert jnp.allclose(norm, ref_norm, atol=1e-5, rtol=1e-5)
    assert jnp.allclose(w, ref_w, atol=1e-5, rtol=1e-5)

    # Also exercise the M-tiled two-pass path (forced tiny block budget so
    # tile_m=8, ragged final M tile) to make sure it compiles and is correct.
    w2p, norm2p = weight_norm_interface(v, g, dim=2, block_bytes=4096)
    w2p = jax.block_until_ready(w2p)
    norm2p = jax.block_until_ready(norm2p)
    assert jnp.allclose(norm2p, ref_norm, atol=1e-5, rtol=1e-5)
    assert jnp.allclose(w2p, ref_w, atol=1e-5, rtol=1e-5)

    print("KERNEL_OK")
</pallas_src>

<mosaic_0001>
module attributes {stable_mosaic.version = 11 : i64} {
  func.func @_wn_single_pass_kernel(%arg0: i32, %arg1: memref<30x128xf32, #tpu.memory_space<vmem>>, %arg2: memref<1x128xf32, #tpu.memory_space<vmem>>, %arg3: memref<30x128xf32, #tpu.memory_space<vmem>>, %arg4: memref<1x128xf32, #tpu.memory_space<vmem>>) attributes {dimension_semantics = [#tpu.dimension_semantics<parallel>], iteration_bounds = array<i64: 1>, scalar_prefetch = 0 : i64, scratch_operands = 0 : i64, tpu.core_type = #tpu.core_type<tc>, window_params = [{transform_indices = @transform_0, window_bounds = array<i64: 30, 128>}, {transform_indices = @transform_1, window_bounds = array<i64: 1, 128>}, {transform_indices = @transform_2, window_bounds = array<i64: 30, 128>}, {transform_indices = @transform_3, window_bounds = array<i64: 1, 128>}]} {
    %c0 = arith.constant 0 : index
    %c0_0 = arith.constant 0 : index
    %0 = vector.load %arg1[%c0, %c0_0] : memref<30x128xf32, #tpu.memory_space<vmem>>, vector<30x128xf32>
    %1 = arith.mulf %0, %0 : vector<30x128xf32>
    %cst = arith.constant dense<0.000000e+00> : vector<128xf32>
    %2 = vector.multi_reduction <add>, %1, %cst [0] : vector<30x128xf32> to vector<128xf32>
    %3 = vector.shape_cast %2 : vector<128xf32> to vector<1x128xf32>
    %4 = math.sqrt %3 : vector<1x128xf32>
    %c0_1 = arith.constant 0 : index
    %c0_2 = arith.constant 0 : index
    %5 = vector.load %arg4[%c0_1, %c0_2] : memref<1x128xf32, #tpu.memory_space<vmem>>, vector<1x128xf32>
    tpu.vector_store %arg4[%c0_1, %c0_2], %4 {strides = array<i32>} : memref<1x128xf32, #tpu.memory_space<vmem>>, vector<1x128xf32>,
    %c0_3 = arith.constant 0 : index
    %c0_4 = arith.constant 0 : index
    %6 = vector.load %arg2[%c0_3, %c0_4] : memref<1x128xf32, #tpu.memory_space<vmem>>, vector<1x128xf32>
    %7 = math.rsqrt %3 : vector<1x128xf32>
    %8 = arith.mulf %6, %7 : vector<1x128xf32>
    %9 = vector.broadcast %8 : vector<1x128xf32> to vector<30x128xf32>
    %10 = arith.mulf %0, %9 : vector<30x128xf32>
    %c0_5 = arith.constant 0 : index
    %c0_6 = arith.constant 0 : index
    %11 = vector.load %arg3[%c0_5, %c0_6] : memref<30x128xf32, #tpu.memory_space<vmem>>, vector<30x128xf32>
    tpu.vector_store %arg3[%c0_5, %c0_6], %10 {strides = array<i32>} : memref<30x128xf32, #tpu.memory_space<vmem>>, vector<30x128xf32>,
    return
  }
  func.func @transform_0(%arg0: i32) -> (i32, i32) {
    %c0_i32 = arith.constant 0 : i32
    %c0_i32_0 = arith.constant 0 : i32
    return %c0_i32, %arg0 : i32, i32
  }
  func.func @transform_1(%arg0: i32) -> (i32, i32) {
    %c0_i32 = arith.constant 0 : i32
    %c0_i32_0 = arith.constant 0 : i32
    return %c0_i32, %arg0 : i32, i32
  }
  func.func @transform_2(%arg0: i32) -> (i32, i32) {
    %c0_i32 = arith.constant 0 : i32
    %c0_i32_0 = arith.constant 0 : i32
    return %c0_i32, %arg0 : i32, i32
  }
  func.func @transform_3(%arg0: i32) -> (i32, i32) {
    %c0_i32 = arith.constant 0 : i32
    %c0_i32_0 = arith.constant 0 : i32
    return %c0_i32, %arg0 : i32, i32
  }
}

</mosaic_0001>

<bundles_post_ra>
// kernel: tpu_custom_call.1
= control target key start
LH: loop header
LB: loop body
LE: loop exit
PB: predicated region body
PF: predicated region fallthrough
CT: control target
= control target key end

     0   :  { %9 = vsyncpa [#allocation3], 0  ;;  %s292_s0 = inlined_call_operand.hbm [shape: f32[30,128], index: 0, kind: input, shape index: {}]   ;;  %s293_s1 = inlined_call_operand.hbm [shape: f32[1,128], index: 1, kind: input, shape index: {}]   ;;  %s294_s2 = inlined_call_operand.hbm [shape: f32[30,128], index: 2, kind: output, shape index: {0}]   ;;  %s295_s3 = inlined_call_operand.hbm [shape: f32[1,128], index: 3, kind: output, shape index: {1}]  }
   0x1   :  { %10 = vsyncpa [#allocation6], 0 }
   0x2   :  { %11 = vsyncpa [#allocation4], 0 }
   0x3   :  { %12 = vsyncpa [#allocation9], 0  ;;  %s17_s14 = sshll.u32 %s292_s0, 4  ;;  %s248_s15 = smov [#allocation2]   ;;  %s18_s14 = int_to_ptr.hbm [resolvable:$true] %s17_s14 }
   0x4   :  { %s19_s16 = sshll.u32 %s248_s15, 4  ;;  %s31_s19 = sshll.u32 %s293_s1, 4  ;;  %s20_s16 = int_to_ptr.vmem [resolvable:$true] %s19_s16  ;;  %s32_s19 = int_to_ptr.hbm [resolvable:$true] %s31_s19 }
   0x5   :  { %s249_s20 = smov 128   ;;  %s250_s21 = smov 8  }
   0x6   :  { %25 = dma.hbm_to_vmem [thread:$0]  %s18_s14, 512, %s20_s16, [#allocation3], %s249_s20, %s249_s20, %s250_s21  }
   0x7   :  { %s251_s22 = smov [#allocation5]  }
   0x8   :  { %s33_s23 = sshll.u32 %s251_s22, 4  ;;  %s34_s23 = int_to_ptr.vmem [resolvable:$true] %s33_s23 }
   0x9   :  { %36 = dma.hbm_to_vmem [thread:$0]  %s32_s19, 16, %s34_s23, [#allocation6]  }
   0xa   :  { %240 = dma.done.wait [#allocation3], 512  }
   0xb   :  { %241 = vsyncadd [#allocation3], 4294966784 }
   0xc   :  { %242 = dma.done.wait [#allocation6], 16  }
   0xd   :  { %243 = vsyncadd [#allocation6], 4294967280  ;;  %v45_v0 = vld [vmem:[#allocation2] sm:$0xff]  ;;  %v46_v1 = vld [vmem:[#allocation2 + $0x8] sm:$0xff]  ;;  %vm55_vm0 = vcmask 1045504   ;;  %s252_s0 = smov [#allocation8]  }
   0xe   :  { %v47_v2 = vld [vmem:[#allocation2 + $0x10] sm:$0xff]  ;;  %v48_v3 = vld [vmem:[#allocation2 + $0x18] sm:$0x3f]  ;;  %v49_v4 = vmul.f32 %v45_v0, %v45_v0  ;;  %v50_v5 = vmul.f32 %v46_v1, %v46_v1  ;;  %v77_v24 = vld [vmem:[#allocation5] sm:$0x1]  ;;  %s118_s1 = sshll.u32 %s252_s0, 4  ;;  %s119_s1 = int_to_ptr.vmem [resolvable:$true] %s118_s1 }
   0xf   :  { %v51_v6 = vmul.f32 %v47_v2, %v47_v2  ;;  %v52_v7 = vmul.f32 %v48_v3, %v48_v3  ;;  %s120_s26 = sshll.u32 %s295_s3, 4  ;;  %s253_s27 = smov [#allocation7]   ;;  %s121_s26 = int_to_ptr.hbm [resolvable:$true] %s120_s26 }
  0x10   :  { %v53_v8 = vadd.f32 %v50_v5, %v49_v4  ;;  %s104_s28 = sshll.u32 %s253_s27, 4  ;;  %s106_s4 = sshll.u32 %s294_s2, 4  ;;  %s105_s28 = int_to_ptr.vmem [resolvable:$true] %s104_s28  ;;  %s107_s4 = int_to_ptr.hbm [resolvable:$true] %s106_s4 }
  0x11   :  { %v56_v9 = vsel %vm55_vm0, %v52_v7, 0.0 }
  0x12   :  { %v54_v10 = vadd.f32 %v53_v8, %v51_v6 }
  0x14   :  { %v57_v11 = vadd.f32 %v56_v9, %v54_v10 }
  0x16   :  { %v58_v12 = vrot.slane %v57_v11, 4 }
  0x18   :  { %v59_v13 = vadd.f32 %v58_v12, %v57_v11 }
  0x1a   :  { %v60_v14 = vrot.slane %v59_v13, 2 }
  0x1c   :  { %v61_v15 = vadd.f32 %v60_v14, %v59_v13 }
  0x1e   :  { %v62_v16 = vrot.slane %v61_v15, 1 }
  0x20   :  { %v63_v17 = vadd.f32 %v62_v16, %v61_v15 }
  0x22   :  { %142 = vrsqrt.f32 %v63_v17  ;;  %vm84_vm1 = vweird.f32 %v63_v17  ;;  %vm71_vm4 = vcmp.eq.f32.partialorder %v63_v17, inf  ;;  %v74_v25 = vand.u32 2147483648, %v63_v17 }
  0x23   :  { %vm73_vm5 = vcmp.eq.f32.partialorder %v63_v17, 0.0 }
  0x28   :  { %v143_v18 = vpop.eup %142 }
  0x29   :  { %v65_v19 = vmul.f32 %v143_v18, %v63_v17  ;;  %vm85_vm2 = vweird.f32 %v143_v18 }
  0x2a   :  { %vm86_vm3 = vmor %vm84_vm1, %vm85_vm2 }
  0x2b   :  { %v66_v20 = vmul.f32 %v143_v18, %v65_v19 }
  0x2d   :  { %v67_v21 = vmul.f32 0.5, %v66_v20 }
  0x2f   :  { %v68_v22 = vsub.f32 1.5, %v67_v21 }
  0x31   :  { %v69_v23 = vmul.f32 %v143_v18, %v68_v22 }
  0x33   :  { %v70_v26 = vmul.f32 %v69_v23, %v63_v17  ;;  %v87_v27 = vsel %vm86_vm3, %v143_v18, %v69_v23 }
  0x34   :  { %v88_v28 = vmul.f32 %v87_v27, %v77_v24 }
  0x35   :  { %v72_v29 = vsel %vm71_vm4, %v63_v17, %v70_v26 }
  0x36   :  { %v75_v30 = vsel %vm73_vm5, %v74_v25, %v72_v29  ;;  %v90_v31 = vperm.slane %v88_v28, 0 }
  0x37   :  { %76 = vst [vmem:[#allocation8] sm:$0x1] %v75_v30 }
  0x38   :  { %v92_v32 = vmul.f32 %v90_v31, %v45_v0  ;;  %v93_v33 = vmul.f32 %v90_v31, %v46_v1  ;;  %v94_v34 = vmul.f32 %v90_v31, %v47_v2  ;;  %123 = dma.vmem_to_hbm [thread:$0]  %s119_s1, 16, %s121_s26, [#allocation9]   ;;  %v95_v35 = vmul.f32 %v90_v31, %v48_v3 }
  0x3a   :  { %96 = vst [vmem:[#allocation7] sm:$0xff] %v92_v32 }
  0x3b   :  { %97 = vst [vmem:[#allocation7 + $0x8] sm:$0xff] %v93_v33 }
  0x3c   :  { %98 = vst [vmem:[#allocation7 + $0x10] sm:$0xff] %v94_v34 }
  0x3d   :  { %99 = vst [vmem:[#allocation7 + $0x18] sm:$0x3f] %v95_v35 }
  0x3e   :  { %112 = dma.vmem_to_hbm [thread:$0]  %s105_s28, 512, %s107_s4, [#allocation4], %s249_s20, %s249_s20, %s250_s21  }
  0x3f   :  { %244 = dma.done.wait [#allocation4], 512  }
  0x40   :  { %245 = vsyncadd [#allocation4], 4294966784 }
  0x41   :  { %246 = dma.done.wait [#allocation9], 16  }
  0x42   :  { %247 = vsyncadd [#allocation9], 4294967280 }
  0x43   :  { %132 = vsyncpa [#allocation3], 1 }
  0x44   :  { %133 = vsyncpa [#allocation6], 1 }
  0x45   :  { %134 = vsyncpa [#allocation4], 1 }
  0x46   :  { %135 = vsyncpa [#allocation9], 1 }

</bundles_post_ra>
